<compile_context>
chip_gen: v5e
topology: v5e:2x2
jax: 0.10.0
libtpu: 0.0.40
codegen_flags: <defaults>
</compile_context>

<pallas_src>
import numpy as np
import jax
import jax.numpy as jnp
from jax.experimental import pallas as pl
from jax.experimental.pallas import tpu as pltpu

INPUT_DIM = 32
HIDDEN_DIMS = (64, 32)
LATENT_DIM = 16
N_CLUSTERS = 5            # unused in forward()
AV_DIM = 2
BATCH = 8
BN_EPS = 1e-5
LN_EPS = 1e-5
LEAKY_SLOPE = 0.2         # nn.LeakyReLU(0.2)

PAD = 128                 # lane width of every fused weight tile
N_TILES = 6               # fused 128x128 weight tiles
W_ROWS = N_TILES * PAD    # 768
VEC_ROWS = 16             # 6 bias rows + LN gamma/beta + padding (multiple of 16 for bf16)
P_ROWS = W_ROWS + VEC_ROWS
LN_G_ROW, LN_B_ROW = 8, 9  # rows inside the vector block
MAX_BLOCK_B = 512         # batch tile cap (conservative for v7x VMEM)


# ------------------------------ Pallas kernel ------------------------------
def vade_forward_kernel(x_ref, av_ref, eps_ref, p_ref,
                        mu_ref, lv_ref, z_ref, rec_ref, avo_ref):
    f32, bf16 = jnp.float32, jnp.bfloat16
    b = x_ref.shape[0]

    # bias rows (6) + LayerNorm gamma/beta, cast once to f32
    vecs = p_ref[W_ROWS:P_ROWS, :].astype(f32)                    # [16, 128]

    def mm(t, a, rows=PAD):
        w = p_ref[t * PAD:t * PAD + rows, :]                      # bf16 [rows,128]
        y = jnp.dot(a.astype(bf16), w, preferred_element_type=f32)
        return y + vecs[t:t + 1, :]                               # fused bias add

    def leaky(t):
        return jnp.maximum(t, LEAKY_SLOPE * t)

    # ---- tile 0: encoder L0 (x -> lanes 0:64)  ⊕  AV L0 (av -> lanes 64:128) ----
    xav = jnp.concatenate(
        [x_ref[...], av_ref[...],
         jnp.zeros((b, PAD - INPUT_DIM - AV_DIM), f32)], axis=-1)  # [b, 128]
    h0 = mm(0, xav)
    lane = jax.lax.broadcasted_iota(jnp.int32, (1, PAD), 1)
    slope0 = jnp.where(lane < HIDDEN_DIMS[0], LEAKY_SLOPE, 0.0).astype(f32)
    h0 = jnp.maximum(h0, h0 * slope0)          # LeakyReLU on 0:64, ReLU on 64:128

    # ---- tile 1: encoder L1 (lanes 0:32)  ⊕  AV L1 (lanes 32:48) ----
    h1 = mm(1, h0)
    a_raw = h1[:, HIDDEN_DIMS[1]:HIDDEN_DIMS[1] + LATENT_DIM]     # AV linear out (pre-LN)
    h1 = leaky(h1)     # extra leaky on AV/zero lanes is ignored (tile-2 rows 32:128 are 0)

    # ---- tile 2: fused mu | logvar head ----
    head = mm(2, h1)
    mu = head[:, :LATENT_DIM]
    logvar = head[:, LATENT_DIM:2 * LATENT_DIM]
    z = mu + jnp.exp(0.5 * logvar) * eps_ref[...]

    # ---- tiles 3..5: decoder (BN folded) + reconstruction head ----
    d = leaky(mm(3, z, rows=LATENT_DIM))       # z is 16-wide -> aligned 16-row slice
    d = leaky(mm(4, d))
    recon = mm(5, d)[:, :INPUT_DIM]

    # ---- AV LayerNorm(16) (biased variance, like torch) ----
    m = jnp.mean(a_raw, axis=-1, keepdims=True)
    v = jnp.mean((a_raw - m) ** 2, axis=-1, keepdims=True)
    ln_g = vecs[LN_G_ROW:LN_G_ROW + 1, :LATENT_DIM]
    ln_b = vecs[LN_B_ROW:LN_B_ROW + 1, :LATENT_DIM]
    a = (a_raw - m) * jax.lax.rsqrt(v + LN_EPS) * ln_g + ln_b

    mu_ref[...] = mu
    lv_ref[...] = logvar
    z_ref[...] = z
    rec_ref[...] = recon
    avo_ref[...] = a


# --------------------------- raw parameter construction ---------------------------
def init_raw_params(key):
    """Deterministic parameter init mirroring the PyTorch module layout."""
    keys = iter(jax.random.split(key, 64))

    def dense(fan_in, fan_out):
        bound = 1.0 / np.sqrt(fan_in)
        w = jax.random.uniform(next(keys), (fan_in, fan_out), jnp.float32, -bound, bound)
        b = jax.random.uniform(next(keys), (fan_out,), jnp.float32, -bound, bound)
        return w, b

    def bn(n):
        return dict(gamma=jnp.ones((n,), jnp.float32), beta=jnp.zeros((n,), jnp.float32),
                    mean=jnp.zeros((n,), jnp.float32), var=jnp.ones((n,), jnp.float32))

    p = {"enc": [], "dec": []}
    prev = INPUT_DIM
    for h in HIDDEN_DIMS:
        w, b = dense(prev, h)
        p["enc"].append((w, b, bn(h)))
        prev = h
    p["mu"] = dense(prev, LATENT_DIM)
    p["logvar"] = dense(prev, LATENT_DIM)

    prev = LATENT_DIM
    for h in HIDDEN_DIMS[::-1]:
        w, b = dense(prev, h)
        p["dec"].append((w, b, bn(h)))
        prev = h
    p["rec"] = dense(HIDDEN_DIMS[0], INPUT_DIM)

    p["av1"] = dense(AV_DIM, 64)
    p["av2"] = dense(64, LATENT_DIM)
    p["ln"] = (jnp.ones((LATENT_DIM,), jnp.float32), jnp.zeros((LATENT_DIM,), jnp.float32))
    return p


# ------------------ BN folding + packing into ONE bf16 slab ------------------
def _fold_bn(w, b, s):
    """Eval-mode BatchNorm folded into the preceding Linear (uses running stats)."""
    scale = s["gamma"] / jnp.sqrt(s["var"] + BN_EPS)
    return w * scale[None, :], (b - s["mean"]) * scale + s["beta"]


def pack_params(p):
    enc0 = _fold_bn(*p["enc"][0])   # (32, 64)
    enc1 = _fold_bn(*p["enc"][1])   # (64, 32)
    head_w = jnp.concatenate([p["mu"][0], p["logvar"][0]], axis=1)   # (32, 32)
    head_b = jnp.concatenate([p["mu"][1], p["logvar"][1]], axis=0)   # (32,)
    dec0 = _fold_bn(*p["dec"][0])   # (16, 32)
    dec1 = _fold_bn(*p["dec"][1])   # (32, 64)
    rec = p["rec"]                  # (64, 32)
    av1 = p["av1"]                  # (2, 64)
    av2 = p["av2"]                  # (64, 16)

    P = np.zeros((P_ROWS, PAD), np.float32)

    def put_w(tile, w, r0, c0):
        w = np.asarray(w)
        P[tile * PAD + r0: tile * PAD + r0 + w.shape[0], c0:c0 + w.shape[1]] = w

    def put_b(tile, b, c0):
        b = np.asarray(b)
        P[W_ROWS + tile, c0:c0 + b.shape[0]] = b

    # tile 0: enc0 ⊕ av1 (block-diagonal)
    put_w(0, enc0[0], 0, 0);             put_b(0, enc0[1], 0)
    put_w(0, av1[0], INPUT_DIM, 64);     put_b(0, av1[1], 64)
    # tile 1: enc1 ⊕ av2 (block-diagonal)
    put_w(1, enc1[0], 0, 0);             put_b(1, enc1[1], 0)
    put_w(1, av2[0], 64, HIDDEN_DIMS[1]); put_b(1, av2[1], HIDDEN_DIMS[1])
    # tile 2: fused mu|logvar head
    put_w(2, head_w, 0, 0);              put_b(2, head_b, 0)
    # tiles 3..5: decoder + reconstruction
    put_w(3, dec0[0], 0, 0);             put_b(3, dec0[1], 0)
    put_w(4, dec1[0], 0, 0);             put_b(4, dec1[1], 0)
    put_w(5, rec[0], 0, 0);              put_b(5, rec[1], 0)
    # LayerNorm gamma / beta
    P[W_ROWS + LN_G_ROW, :LATENT_DIM] = np.asarray(p["ln"][0])
    P[W_ROWS + LN_B_ROW, :LATENT_DIM] = np.asarray(p["ln"][1])
    return jnp.asarray(P, dtype=jnp.bfloat16)


# ------------------------------ wrapper ------------------------------
def _pallas_forward(x, av, eps, params, blk):
    b = x.shape[0]
    batch_spec = lambda d: pl.BlockSpec((blk, d), lambda i: (i, 0))
    return pl.pallas_call(
        vade_forward_kernel,
        grid=(b // blk,),
        in_specs=[batch_spec(INPUT_DIM), batch_spec(AV_DIM), batch_spec(LATENT_DIM),
                  pl.BlockSpec((P_ROWS, PAD), lambda i: (0, 0))],   # params stay resident
        out_specs=(batch_spec(LATENT_DIM), batch_spec(LATENT_DIM), batch_spec(LATENT_DIM),
                   batch_spec(INPUT_DIM), batch_spec(LATENT_DIM)),
        out_shape=(
            jax.ShapeDtypeStruct((b, LATENT_DIM), jnp.float32),   # mu
            jax.ShapeDtypeStruct((b, LATENT_DIM), jnp.float32),   # logvar
            jax.ShapeDtypeStruct((b, LATENT_DIM), jnp.float32),   # z
            jax.ShapeDtypeStruct((b, INPUT_DIM), jnp.float32),    # recon_X
            jax.ShapeDtypeStruct((b, LATENT_DIM), jnp.float32),   # av_encoded
        ),
        compiler_params=pltpu.CompilerParams(dimension_semantics=("parallel",)),
    )(x, av, eps, params)


@jax.jit
def vade_forward(x, av, eps, params):
    b = x.shape[0]
    bp = max(8, -(-b // 8) * 8)            # pad batch to a multiple of 8
    if bp <= MAX_BLOCK_B:
        blk = bp
    else:
        blk = MAX_BLOCK_B
        bp = -(-bp // blk) * blk
    if bp != b:
        padb = lambda t: jnp.pad(t, ((0, bp - b), (0, 0)))
        x, av, eps = padb(x), padb(av), padb(eps)
    outs = _pallas_forward(x, av, eps, params, blk)
    if bp != b:
        outs = tuple(o[:b] for o in outs)
    return outs


# ------------------------- pure-JAX reference (unfolded, f32) -------------------------
def reference_forward(x, av, eps, p):
    def bn_eval(t, s):
        return (t - s["mean"]) * jax.lax.rsqrt(s["var"] + BN_EPS) * s["gamma"] + s["beta"]

    def leaky(t):
        return jnp.where(t > 0.0, t, LEAKY_SLOPE * t)

    h = x
    for (w, b, s) in p["enc"]:
        h = leaky(bn_eval(h @ w + b, s))
    mu = h @ p["mu"][0] + p["mu"][1]
    logvar = h @ p["logvar"][0] + p["logvar"][1]
    z = mu + jnp.exp(0.5 * logvar) * eps
    d = z
    for (w, b, s) in p["dec"]:
        d = leaky(bn_eval(d @ w + b, s))
    recon = d @ p["rec"][0] + p["rec"][1]
    a = jnp.maximum(av @ p["av1"][0] + p["av1"][1], 0.0)
    a = a @ p["av2"][0] + p["av2"][1]
    m = jnp.mean(a, -1, keepdims=True)
    v = jnp.mean((a - m) ** 2, -1, keepdims=True)
    a = (a - m) * jax.lax.rsqrt(v + LN_EPS) * p["ln"][0] + p["ln"][1]
    return mu, logvar, z, recon, a


if __name__ == "__main__":
    key = jax.random.PRNGKey(0)
    kx, kav, keps, kp = jax.random.split(key, 4)
    X = jax.random.normal(kx, (BATCH, INPUT_DIM), jnp.float32)
    AV = jax.random.normal(kav, (BATCH, AV_DIM), jnp.float32)
    eps = jax.random.normal(keps, (BATCH, LATENT_DIM), jnp.float32)   # randn_like noise

    raw = init_raw_params(kp)
    params = pack_params(raw)

    outs = jax.block_until_ready(vade_forward(X, AV, eps, params))
    mu, logvar, z, recon_X, av_encoded = outs

    assert mu.shape == (BATCH, LATENT_DIM)
    assert logvar.shape == (BATCH, LATENT_DIM)
    assert z.shape == (BATCH, LATENT_DIM)
    assert recon_X.shape == (BATCH, INPUT_DIM)
    assert av_encoded.shape == (BATCH, LATENT_DIM)
    assert all(bool(jnp.all(jnp.isfinite(o))) for o in outs)

    # correctness vs. pure-JAX f32 (unfolded, unfused) reference
    refs = reference_forward(X, AV, eps, raw)
    for got, want in zip(outs, refs):
        assert bool(jnp.allclose(got, want, atol=5e-2, rtol=5e-2)), "mismatch vs reference"

    print("KERNEL_OK")
</pallas_src>

<mosaic_0001>
module attributes {stable_mosaic.version = 11 : i64} {
  func.func @vade_forward_kernel(%arg0: i32, %arg1: memref<8x32xf32, #tpu.memory_space<vmem>>, %arg2: memref<8x2xf32, #tpu.memory_space<vmem>>, %arg3: memref<8x16xf32, #tpu.memory_space<vmem>>, %arg4: memref<784x128xbf16, #tpu.memory_space<vmem>>, %arg5: memref<8x16xf32, #tpu.memory_space<vmem>>, %arg6: memref<8x16xf32, #tpu.memory_space<vmem>>, %arg7: memref<8x16xf32, #tpu.memory_space<vmem>>, %arg8: memref<8x32xf32, #tpu.memory_space<vmem>>, %arg9: memref<8x16xf32, #tpu.memory_space<vmem>>) attributes {dimension_semantics = [#tpu.dimension_semantics<parallel>], iteration_bounds = array<i64: 1>, scalar_prefetch = 0 : i64, scratch_operands = 0 : i64, tpu.core_type = #tpu.core_type<tc>, window_params = [{transform_indices = @transform_0, window_bounds = array<i64: 8, 32>}, {transform_indices = @transform_1, window_bounds = array<i64: 8, 2>}, {transform_indices = @transform_2, window_bounds = array<i64: 8, 16>}, {pipeline_mode = #tpu.pipeline_mode<synchronous>, transform_indices = @transform_3, window_bounds = array<i64: 784, 128>}, {transform_indices = @transform_4, window_bounds = array<i64: 8, 16>}, {transform_indices = @transform_5, window_bounds = array<i64: 8, 16>}, {transform_indices = @transform_6, window_bounds = array<i64: 8, 16>}, {transform_indices = @transform_7, window_bounds = array<i64: 8, 32>}, {transform_indices = @transform_8, window_bounds = array<i64: 8, 16>}]} {
    %c768 = arith.constant 768 : index
    %c0 = arith.constant 0 : index
    %0 = vector.load %arg4[%c768, %c0] : memref<784x128xbf16, #tpu.memory_space<vmem>>, vector<16x128xbf16>
    %1 = arith.extf %0 : vector<16x128xbf16> to vector<16x128xf32>
    %c0_0 = arith.constant 0 : index
    %c0_1 = arith.constant 0 : index
    %2 = vector.load %arg1[%c0_0, %c0_1] : memref<8x32xf32, #tpu.memory_space<vmem>>, vector<8x32xf32>
    %c0_2 = arith.constant 0 : index
    %c0_3 = arith.constant 0 : index
    %3 = vector.load %arg2[%c0_2, %c0_3] : memref<8x2xf32, #tpu.memory_space<vmem>>, vector<8x2xf32>
    %cst = arith.constant 0.000000e+00 : f32
    %4 = vector.broadcast %cst : f32 to vector<8x94xf32>
    %5 = tpu.concatenate %2, %3, %4 in 1 : vector<8x32xf32>, vector<8x2xf32>, vector<8x94xf32> -> vector<8x128xf32>
    %c0_4 = arith.constant 0 : index
    %c0_5 = arith.constant 0 : index
    %6 = vector.load %arg4[%c0_4, %c0_5] : memref<784x128xbf16, #tpu.memory_space<vmem>>, vector<128x128xbf16>
    %7 = arith.truncf %5 : vector<8x128xf32> to vector<8x128xbf16>
    %cst_6 = arith.constant dense<0.000000e+00> : vector<8x128xf32>
    %8 = tpu.matmul %7, %6, %cst_6 {dimension_numbers = #tpu.dot_dimension_numbers<[1], [0], [0], [1], [0, 0, 1, 1], [], []>} : vector<8x128xbf16>, vector<128x128xbf16>, vector<8x128xf32> -> vector<8x128xf32>
    %9 = vector.extract_strided_slice %1 {offsets = [0, 0], sizes = [1, 128], strides = [1, 1]} : vector<16x128xf32> to vector<1x128xf32>
    %10 = vector.broadcast %9 : vector<1x128xf32> to vector<8x128xf32>
    %11 = arith.addf %8, %10 : vector<8x128xf32>
    %12 = tpu.iota {dimensions = array<i32: 1>} : vector<1x128xi32>
    %c64_i32 = arith.constant 64 : i32
    %13 = vector.broadcast %c64_i32 : i32 to vector<1x128xi32>
    %14 = arith.cmpi slt, %12, %13 : vector<1x128xi32>
    %cst_7 = arith.constant 2.000000e-01 : f32
    %cst_8 = arith.constant 0.000000e+00 : f32
    %15 = vector.broadcast %cst_7 : f32 to vector<1x128xf32>
    %16 = vector.broadcast %cst_8 : f32 to vector<1x128xf32>
    %17 = arith.select %14, %15, %16 : vector<1x128xi1>, vector<1x128xf32>
    %18 = vector.broadcast %17 : vector<1x128xf32> to vector<8x128xf32>
    %19 = arith.mulf %11, %18 : vector<8x128xf32>
    %20 = arith.maximumf %11, %19 : vector<8x128xf32>
    %c128 = arith.constant 128 : index
    %c0_9 = arith.constant 0 : index
    %21 = vector.load %arg4[%c128, %c0_9] : memref<784x128xbf16, #tpu.memory_space<vmem>>, vector<128x128xbf16>
    %22 = arith.truncf %20 : vector<8x128xf32> to vector<8x128xbf16>
    %cst_10 = arith.constant dense<0.000000e+00> : vector<8x128xf32>
    %23 = tpu.matmul %22, %21, %cst_10 {dimension_numbers = #tpu.dot_dimension_numbers<[1], [0], [0], [1], [0, 0, 1, 1], [], []>} : vector<8x128xbf16>, vector<128x128xbf16>, vector<8x128xf32> -> vector<8x128xf32>
    %24 = vector.extract_strided_slice %1 {offsets = [1, 0], sizes = [1, 128], strides = [1, 1]} : vector<16x128xf32> to vector<1x128xf32>
    %25 = vector.broadcast %24 : vector<1x128xf32> to vector<8x128xf32>
    %26 = arith.addf %23, %25 : vector<8x128xf32>
    %27 = vector.extract_strided_slice %26 {offsets = [0, 32], sizes = [8, 16], strides = [1, 1]} : vector<8x128xf32> to vector<8x16xf32>
    %cst_11 = arith.constant 2.000000e-01 : f32
    %28 = vector.broadcast %cst_11 : f32 to vector<8x128xf32>
    %29 = arith.mulf %28, %26 : vector<8x128xf32>
    %30 = arith.maximumf %26, %29 : vector<8x128xf32>
    %c256 = arith.constant 256 : index
    %c0_12 = arith.constant 0 : index
    %31 = vector.load %arg4[%c256, %c0_12] : memref<784x128xbf16, #tpu.memory_space<vmem>>, vector<128x128xbf16>
    %32 = arith.truncf %30 : vector<8x128xf32> to vector<8x128xbf16>
    %cst_13 = arith.constant dense<0.000000e+00> : vector<8x128xf32>
    %33 = tpu.matmul %32, %31, %cst_13 {dimension_numbers = #tpu.dot_dimension_numbers<[1], [0], [0], [1], [0, 0, 1, 1], [], []>} : vector<8x128xbf16>, vector<128x128xbf16>, vector<8x128xf32> -> vector<8x128xf32>
    %34 = vector.extract_strided_slice %1 {offsets = [2, 0], sizes = [1, 128], strides = [1, 1]} : vector<16x128xf32> to vector<1x128xf32>
    %35 = vector.broadcast %34 : vector<1x128xf32> to vector<8x128xf32>
    %36 = arith.addf %33, %35 : vector<8x128xf32>
    %37 = vector.extract_strided_slice %36 {offsets = [0, 0], sizes = [8, 16], strides = [1, 1]} : vector<8x128xf32> to vector<8x16xf32>
    %38 = vector.extract_strided_slice %36 {offsets = [0, 16], sizes = [8, 16], strides = [1, 1]} : vector<8x128xf32> to vector<8x16xf32>
    %cst_14 = arith.constant 5.000000e-01 : f32
    %39 = vector.broadcast %cst_14 : f32 to vector<8x16xf32>
    %40 = arith.mulf %39, %38 : vector<8x16xf32>
    %41 = math.exp %40 : vector<8x16xf32>
    %c0_15 = arith.constant 0 : index
    %c0_16 = arith.constant 0 : index
    %42 = vector.load %arg3[%c0_15, %c0_16] : memref<8x16xf32, #tpu.memory_space<vmem>>, vector<8x16xf32>
    %43 = arith.mulf %41, %42 : vector<8x16xf32>
    %44 = arith.addf %37, %43 : vector<8x16xf32>
    %c384 = arith.constant 384 : index
    %c0_17 = arith.constant 0 : index
    %45 = vector.load %arg4[%c384, %c0_17] : memref<784x128xbf16, #tpu.memory_space<vmem>>, vector<16x128xbf16>
    %46 = arith.truncf %44 : vector<8x16xf32> to vector<8x16xbf16>
    %cst_18 = arith.constant dense<0.000000e+00> : vector<8x128xf32>
    %47 = tpu.matmul %46, %45, %cst_18 {dimension_numbers = #tpu.dot_dimension_numbers<[1], [0], [0], [1], [0, 0, 1, 1], [], []>} : vector<8x16xbf16>, vector<16x128xbf16>, vector<8x128xf32> -> vector<8x128xf32>
    %48 = vector.extract_strided_slice %1 {offsets = [3, 0], sizes = [1, 128], strides = [1, 1]} : vector<16x128xf32> to vector<1x128xf32>
    %49 = vector.broadcast %48 : vector<1x128xf32> to vector<8x128xf32>
    %50 = arith.addf %47, %49 : vector<8x128xf32>
    %cst_19 = arith.constant 2.000000e-01 : f32
    %51 = vector.broadcast %cst_19 : f32 to vector<8x128xf32>
    %52 = arith.mulf %51, %50 : vector<8x128xf32>
    %53 = arith.maximumf %50, %52 : vector<8x128xf32>
    %c512 = arith.constant 512 : index
    %c0_20 = arith.constant 0 : index
    %54 = vector.load %arg4[%c512, %c0_20] : memref<784x128xbf16, #tpu.memory_space<vmem>>, vector<128x128xbf16>
    %55 = arith.truncf %53 : vector<8x128xf32> to vector<8x128xbf16>
    %cst_21 = arith.constant dense<0.000000e+00> : vector<8x128xf32>
    %56 = tpu.matmul %55, %54, %cst_21 {dimension_numbers = #tpu.dot_dimension_numbers<[1], [0], [0], [1], [0, 0, 1, 1], [], []>} : vector<8x128xbf16>, vector<128x128xbf16>, vector<8x128xf32> -> vector<8x128xf32>
    %57 = vector.extract_strided_slice %1 {offsets = [4, 0], sizes = [1, 128], strides = [1, 1]} : vector<16x128xf32> to vector<1x128xf32>
    %58 = vector.broadcast %57 : vector<1x128xf32> to vector<8x128xf32>
    %59 = arith.addf %56, %58 : vector<8x128xf32>
    %cst_22 = arith.constant 2.000000e-01 : f32
    %60 = vector.broadcast %cst_22 : f32 to vector<8x128xf32>
    %61 = arith.mulf %60, %59 : vector<8x128xf32>
    %62 = arith.maximumf %59, %61 : vector<8x128xf32>
    %c640 = arith.constant 640 : index
    %c0_23 = arith.constant 0 : index
    %63 = vector.load %arg4[%c640, %c0_23] : memref<784x128xbf16, #tpu.memory_space<vmem>>, vector<128x128xbf16>
    %64 = arith.truncf %62 : vector<8x128xf32> to vector<8x128xbf16>
    %cst_24 = arith.constant dense<0.000000e+00> : vector<8x128xf32>
    %65 = tpu.matmul %64, %63, %cst_24 {dimension_numbers = #tpu.dot_dimension_numbers<[1], [0], [0], [1], [0, 0, 1, 1], [], []>} : vector<8x128xbf16>, vector<128x128xbf16>, vector<8x128xf32> -> vector<8x128xf32>
    %66 = vector.extract_strided_slice %1 {offsets = [5, 0], sizes = [1, 128], strides = [1, 1]} : vector<16x128xf32> to vector<1x128xf32>
    %67 = vector.broadcast %66 : vector<1x128xf32> to vector<8x128xf32>
    %68 = arith.addf %65, %67 : vector<8x128xf32>
    %69 = vector.extract_strided_slice %68 {offsets = [0, 0], sizes = [8, 32], strides = [1, 1]} : vector<8x128xf32> to vector<8x32xf32>
    %cst_25 = arith.constant dense<0.000000e+00> : vector<8xf32>
    %70 = vector.multi_reduction <add>, %27, %cst_25 [1] : vector<8x16xf32> to vector<8xf32>
    %71 = vector.shape_cast %70 : vector<8xf32> to vector<8x1xf32>
    %cst_26 = arith.constant 1.600000e+01 : f32
    %72 = vector.broadcast %cst_26 : f32 to vector<8x1xf32>
    %73 = arith.divf %71, %72 : vector<8x1xf32>
    %74 = vector.broadcast %73 : vector<8x1xf32> to vector<8x16xf32>
    %75 = arith.subf %27, %74 : vector<8x16xf32>
    %76 = arith.mulf %75, %75 : vector<8x16xf32>
    %cst_27 = arith.constant dense<0.000000e+00> : vector<8xf32>
    %77 = vector.multi_reduction <add>, %76, %cst_27 [1] : vector<8x16xf32> to vector<8xf32>
    %78 = vector.shape_cast %77 : vector<8xf32> to vector<8x1xf32>
    %cst_28 = arith.constant 1.600000e+01 : f32
    %79 = vector.broadcast %cst_28 : f32 to vector<8x1xf32>
    %80 = arith.divf %78, %79 : vector<8x1xf32>
    %81 = vector.extract_strided_slice %1 {offsets = [8, 0], sizes = [1, 16], strides = [1, 1]} : vector<16x128xf32> to vector<1x16xf32>
    %82 = vector.extract_strided_slice %1 {offsets = [9, 0], sizes = [1, 16], strides = [1, 1]} : vector<16x128xf32> to vector<1x16xf32>
    %83 = vector.broadcast %73 : vector<8x1xf32> to vector<8x16xf32>
    %84 = arith.subf %27, %83 : vector<8x16xf32>
    %cst_29 = arith.constant 9.99999974E-6 : f32
    %85 = vector.broadcast %cst_29 : f32 to vector<8x1xf32>
    %86 = arith.addf %80, %85 : vector<8x1xf32>
    %87 = math.rsqrt %86 : vector<8x1xf32>
    %88 = vector.broadcast %87 : vector<8x1xf32> to vector<8x16xf32>
    %89 = arith.mulf %84, %88 : vector<8x16xf32>
    %90 = vector.broadcast %81 : vector<1x16xf32> to vector<8x16xf32>
    %91 = arith.mulf %89, %90 : vector<8x16xf32>
    %92 = vector.broadcast %82 : vector<1x16xf32> to vector<8x16xf32>
    %93 = arith.addf %91, %92 : vector<8x16xf32>
    %c0_30 = arith.constant 0 : index
    %c0_31 = arith.constant 0 : index
    %94 = vector.load %arg5[%c0_30, %c0_31] : memref<8x16xf32, #tpu.memory_space<vmem>>, vector<8x16xf32>
    tpu.vector_store %arg5[%c0_30, %c0_31], %37 {strides = array<i32>} : memref<8x16xf32, #tpu.memory_space<vmem>>, vector<8x16xf32>,
    %c0_32 = arith.constant 0 : index
    %c0_33 = arith.constant 0 : index
    %95 = vector.load %arg6[%c0_32, %c0_33] : memref<8x16xf32, #tpu.memory_space<vmem>>, vector<8x16xf32>
    tpu.vector_store %arg6[%c0_32, %c0_33], %38 {strides = array<i32>} : memref<8x16xf32, #tpu.memory_space<vmem>>, vector<8x16xf32>,
    %c0_34 = arith.constant 0 : index
    %c0_35 = arith.constant 0 : index
    %96 = vector.load %arg7[%c0_34, %c0_35] : memref<8x16xf32, #tpu.memory_space<vmem>>, vector<8x16xf32>
    tpu.vector_store %arg7[%c0_34, %c0_35], %44 {strides = array<i32>} : memref<8x16xf32, #tpu.memory_space<vmem>>, vector<8x16xf32>,
    %c0_36 = arith.constant 0 : index
    %c0_37 = arith.constant 0 : index
    %97 = vector.load %arg8[%c0_36, %c0_37] : memref<8x32xf32, #tpu.memory_space<vmem>>, vector<8x32xf32>
    tpu.vector_store %arg8[%c0_36, %c0_37], %69 {strides = array<i32>} : memref<8x32xf32, #tpu.memory_space<vmem>>, vector<8x32xf32>,
    %c0_38 = arith.constant 0 : index
    %c0_39 = arith.constant 0 : index
    %98 = vector.load %arg9[%c0_38, %c0_39] : memref<8x16xf32, #tpu.memory_space<vmem>>, vector<8x16xf32>
    tpu.vector_store %arg9[%c0_38, %c0_39], %93 {strides = array<i32>} : memref<8x16xf32, #tpu.memory_space<vmem>>, vector<8x16xf32>,
    return
  }
  func.func @transform_0(%arg0: i32) -> (i32, i32) {
    %c0_i32 = arith.constant 0 : i32
    %c0_i32_0 = arith.constant 0 : i32
    return %arg0, %c0_i32 : i32, i32
  }
  func.func @transform_1(%arg0: i32) -> (i32, i32) {
    %c0_i32 = arith.constant 0 : i32
    %c0_i32_0 = arith.constant 0 : i32
    return %arg0, %c0_i32 : i32, i32
  }
  func.func @transform_2(%arg0: i32) -> (i32, i32) {
    %c0_i32 = arith.constant 0 : i32
    %c0_i32_0 = arith.constant 0 : i32
    return %arg0, %c0_i32 : i32, i32
  }
  func.func @transform_3(%arg0: i32) -> (i32, i32) {
    %c0_i32 = arith.constant 0 : i32
    %c0_i32_0 = arith.constant 0 : i32
    %c0_i32_1 = arith.constant 0 : i32
    return %c0_i32, %c0_i32_0 : i32, i32
  }
  func.func @transform_4(%arg0: i32) -> (i32, i32) {
    %c0_i32 = arith.constant 0 : i32
    %c0_i32_0 = arith.constant 0 : i32
    return %arg0, %c0_i32 : i32, i32
  }
  func.func @transform_5(%arg0: i32) -> (i32, i32) {
    %c0_i32 = arith.constant 0 : i32
    %c0_i32_0 = arith.constant 0 : i32
    return %arg0, %c0_i32 : i32, i32
  }
  func.func @transform_6(%arg0: i32) -> (i32, i32) {
    %c0_i32 = arith.constant 0 : i32
    %c0_i32_0 = arith.constant 0 : i32
    return %arg0, %c0_i32 : i32, i32
  }
  func.func @transform_7(%arg0: i32) -> (i32, i32) {
    %c0_i32 = arith.constant 0 : i32
    %c0_i32_0 = arith.constant 0 : i32
    return %arg0, %c0_i32 : i32, i32
  }
  func.func @transform_8(%arg0: i32) -> (i32, i32) {
    %c0_i32 = arith.constant 0 : i32
    %c0_i32_0 = arith.constant 0 : i32
    return %arg0, %c0_i32 : i32, i32
  }
}

</mosaic_0001>

<bundles_post_ra>
// kernel: vade_forward.1
= control target key start
LH: loop header
LB: loop body
LE: loop exit
PB: predicated region body
PF: predicated region fallthrough
CT: control target
= control target key end

     0   :  { %14 = vsyncpa [#allocation3], 0  ;;  %s1202_s0 = inlined_call_operand.vmem [shape: f32[8,32], index: 0, kind: input, shape index: {}]   ;;  %s1203_s1 = inlined_call_operand.vmem [shape: f32[8,2], index: 1, kind: input, shape index: {}]   ;;  %s1204_s2 = inlined_call_operand.hbm [shape: f32[8,16], index: 2, kind: input, shape index: {}]   ;;  %s1205_s3 = inlined_call_operand.hbm [shape: bf16[784,128], index: 3, kind: input, shape index: {}]   ;;  %s1206_s4 = inlined_call_operand.hbm [shape: f32[8,16], index: 4, kind: output, shape index: {0}]   ;;  %s1207_s5 = inlined_call_operand.hbm [shape: f32[8,16], index: 5, kind: output, shape index: {1}]   ;;  %s1208_s6 = inlined_call_operand.hbm [shape: f32[8,16], index: 6, kind: output, shape index: {2}]   ;;  %s1209_s7 = inlined_call_operand.hbm [shape: f32[8,32], index: 7, kind: output, shape index: {3}]   ;;  %s1210_s8 = inlined_call_operand.hbm [shape: f32[8,16], index: 8, kind: output, shape index: {4}]  }
   0x1   :  { %15 = vsyncpa [#allocation6], 0 }
   0x2   :  { %16 = vsyncpa [#allocation4], 0 }
   0x3   :  { %17 = vsyncpa [#allocation9], 0 }
   0x4   :  { %18 = vsyncpa [#allocation12], 0  ;;  %s28_s29 = sshll.u32 %s1204_s2, 4  ;;  %s1078_s30 = smov [#allocation2]   ;;  %s29_s29 = int_to_ptr.hbm [resolvable:$true] %s28_s29 }
   0x5   :  { %s30_s9 = sshll.u32 %s1078_s30, 4  ;;  %s38_s12 = sshll.u32 %s1205_s3, 4  ;;  %s31_s9 = int_to_ptr.vmem [resolvable:$true] %s30_s9  ;;  %s39_s12 = int_to_ptr.hbm [resolvable:$true] %s38_s12 }
   0x6   :  { %33 = dma.hbm_to_vmem [thread:$0]  %s29_s29, 128, %s31_s9, [#allocation3]  }
   0x7   :  { %s1079_s13 = smov [#allocation5]   ;;  %s1080_s15 = smov 64  }
   0x8   :  { %s40_s14 = sshll.u32 %s1079_s13, 4  ;;  %s1081_s16 = smov 4   ;;  %s41_s14 = int_to_ptr.vmem [resolvable:$true] %s40_s14 }
   0x9   :  { %46 = dma.hbm_to_vmem [thread:$0]  %s39_s12, 6272, %s41_s14, [#allocation6], %s1080_s15, %s1080_s15, %s1081_s16  }
   0xa   :  { %1068 = dma.done.wait [#allocation3], 128  }
   0xb   :  { %1069 = vsyncadd [#allocation3], 4294967168 }
   0xc   :  { %1070 = dma.done.wait [#allocation6], 6272  }
   0xd   :  { %1071 = vsyncadd [#allocation6], 4294961024  ;;  %v61_v0 = vld [vmem:[%s1203_s1] sm:$0xff]  ;;  %s1082_s18 = smov 32   ;;  %v834_v2 = vld [vmem:[#allocation5 + $0x30] sm:$0xff]  ;;  %vm66_vm0 = vcmask 261120   ;;  %v149_v25 = vlaneseq }
   0xe   :  { %v835_v1 = vld [vmem:[#allocation5 + $0x38] sm:$0xff]  ;;  %63 = vrot.lane.b32.xlu0 %v61_v0, %s1082_s18  ;;  %v833_v3 = vld [vmem:[#allocation5 + $0x28] sm:$0xff]  ;;  %v832_v4 = vld [vmem:[#allocation5 + $0x20] sm:$0xff]  ;;  %vm68_vm1 = vcmask 277504   ;;  %v1083_v33 = vmov 0.0   ;;  %vm339_vm4 = vcmask 130048  }
   0xf   :  { %136 = vmatpush.bf16.msra.mxu0 %v835_v1  ;;  %v831_v5 = vld [vmem:[#allocation5 + $0x18] sm:$0xff]  ;;  %v830_v6 = vld [vmem:[#allocation5 + $0x10] sm:$0xff]  ;;  %v829_v7 = vld [vmem:[#allocation5 + $0x8] sm:$0xff]  ;;  %v150_v29 = vand.u32 127, %v149_v25  ;;  %s1085_s19 = smov 112   ;;  %s1086_s20 = smov 96  }
  0x10   :  { %v828_v8 = vld [vmem:[#allocation5] sm:$0xff]  ;;  %v843_v9 = vld [vmem:[#allocation5 + $0x78] sm:$0xff]  ;;  %v842_v10 = vld [vmem:[#allocation5 + $0x70] sm:$0xff]  ;;  %s1088_s21 = smov [#allocation8]   ;;  %s598_s25 = sshll.u32 %s1207_s5, 4  ;;  %s599_s25 = int_to_ptr.hbm [resolvable:$true] %s598_s25 }
  0x11   :  { %221 = vmatpush.bf16.msra.mxu1 %v843_v9  ;;  %v841_v11 = vld [vmem:[#allocation5 + $0x68] sm:$0xff]  ;;  %v840_v12 = vld [vmem:[#allocation5 + $0x60] sm:$0xff]  ;;  %v839_v13 = vld [vmem:[#allocation5 + $0x58] sm:$0xff]  ;;  %vm151_vm3 = vcmp.lt.s32.totalorder %v150_v29, 64  ;;  %s596_s22 = sshll.u32 %s1088_s21, 4  ;;  %s587_s28 = sshll.u32 %s1206_s4, 4  ;;  %s597_s22 = int_to_ptr.vmem [resolvable:$true] %s596_s22  ;;  %s588_s28 = int_to_ptr.hbm [resolvable:$true] %s587_s28 }
  0x12   :  { %v838_v14 = vld [vmem:[#allocation5 + $0x50] sm:$0xff]  ;;  %v60_v15 = vld [vmem:[%s1202_s0] sm:$0xff]  ;;  %vm692_vm2 = vmpackc.low %vm68_vm1, %vm68_vm1  ;;  %v152_v34 = vsel %vm151_vm3, 0.2, %v1083_v33  ;;  %s1084_s0 = smov 16   ;;  %s1089_s29 = smov [#allocation7]  }
  0x13   :  { %137 = vmatpush.bf16.msra.mxu0 %v834_v2  ;;  %v837_v19 = vld [vmem:[#allocation5 + $0x48] sm:$0xff]  ;;  %v836_v20 = vld [vmem:[#allocation5 + $0x40] sm:$0xff]  ;;  %v851_v21 = vld [vmem:[#allocation5 + $0xb8] sm:$0xff]  ;;  %s585_s30 = sshll.u32 %s1089_s29, 4  ;;  %s1090_s5 = smov [#allocation10]   ;;  %s586_s30 = int_to_ptr.vmem [resolvable:$true] %s585_s30 }
  0x14   :  { %302 = vmatpush.bf16.msra.mxu2 %v851_v21  ;;  %v850_v22 = vld [vmem:[#allocation5 + $0xb0] sm:$0xff]  ;;  %v849_v23 = vld [vmem:[#allocation5 + $0xa8] sm:$0xff]  ;;  %v848_v24 = vld [vmem:[#allocation5 + $0xa0] sm:$0xff]  ;;  %s607_s9 = sshll.u32 %s1090_s5, 4  ;;  %s609_s12 = sshll.u32 %s1208_s6, 4  ;;  %s608_s9 = int_to_ptr.vmem [resolvable:$true] %s607_s9  ;;  %s610_s12 = int_to_ptr.hbm [resolvable:$true] %s609_s12 }
  0x15   :  { %222 = vmatpush.bf16.msra.mxu1 %v842_v10  ;;  %v873_v26 = vld [vmem:[#allocation5 + $0x180] sm:$0xff]   ;;  %v847_v27 = vld [vmem:[#allocation5 + $0x98] sm:$0xff]  ;;  %v846_v30 = vld [vmem:[#allocation5 + $0x90] sm:$0xff]  ;;  %s1091_s4 = smov [#allocation11]   ;;  %s620_s16 = sshll.u32 %s1209_s7, 4  ;;  %s621_s16 = int_to_ptr.hbm [resolvable:$true] %s620_s16 }
  0x16   :  { %v1152_v28 = vunpack.c.l.bf16 %v873_v26  ;;  %v845_v40 = vld [vmem:[#allocation5 + $0x88] sm:$0xff]  ;;  %v844_v41 = vld [vmem:[#allocation5 + $0x80] sm:$0xff]  ;;  %v318_v42 = vld [vmem:[#allocation2] sm:$0xff]  ;;  %v872_v59 = vunpack.c.h.bf16 %v873_v26  ;;  %s618_s13 = sshll.u32 %s1091_s4, 4  ;;  %s1092_s6 = smov [#allocation13]   ;;  %s619_s13 = int_to_ptr.vmem [resolvable:$true] %s618_s13 }
  0x17   :  { %138 = vmatpush.bf16.msra.mxu0 %v833_v3  ;;  %320 = vrot.lane.b32.xlu0 %v318_v42, %s1084_s0  ;;  %v852_v63 = vld [vmem:[#allocation5 + $0xc0] sm:$0xff]  ;;  %v860_v0 = vld [vmem:[#allocation5 + $0x138] sm:$0xff]  ;;  %v859_v1 = vld [vmem:[#allocation5 + $0x130] sm:$0xff]  ;;  %s629_s2 = sshll.u32 %s1092_s6, 4  ;;  %s631_s1 = sshll.u32 %s1210_s8, 4  ;;  %s630_s2 = int_to_ptr.vmem [resolvable:$true] %s629_s2  ;;  %s632_s1 = int_to_ptr.hbm [resolvable:$true] %s631_s1 }
  0x18   :  { %303 = vmatpush.bf16.msra.mxu2 %v850_v22  ;;  %v87_v31 = vperm.slane %v1152_v28, 0  ;;  %v172_v43 = vperm.slane %v1152_v28, 1  ;;  %v253_v50 = vperm.slane %v1152_v28, 2  ;;  %v555_v60 = vperm.slane %v872_v59, 0  ;;  %350 = vmatpush.bf16.msra.mxu3 %v852_v63  ;;  %v858_v2 = vld [vmem:[#allocation5 + $0x128] sm:$0xff]  ;;  %v857_v10 = vld [vmem:[#allocation5 + $0x120] sm:$0xff] }
  0x19   :  { %223 = vmatpush.bf16.msra.mxu1 %v841_v11  ;;  %v561_v61 = vperm.slane %v872_v59, 1  ;;  %v856_v11 = vld [vmem:[#allocation5 + $0x118] sm:$0xff]  ;;  %v332_v26 = vperm.slane %v1152_v28, 3  ;;  %v862_v42 = vld [vmem:[#allocation5 + $0x148] sm:$0xff] }
  0x1b   :  { %139 = vmatpush.bf16.msra.mxu0 %v832_v4  ;;  %v889_v62 = vpack.i.bf16 %v561_v61, %v555_v60 }
  0x1c   :  { %304 = vmatpush.bf16.msra.mxu2 %v849_v23  ;;  %424 = vmatpush.bf16.msrb.mxu3 %v860_v0 }
  0x1d   :  { %224 = vmatpush.bf16.msra.mxu1 %v840_v12  ;;  %v1087_v12 = vmov 16.0  }
  0x1f   :  { %140 = vmatpush.bf16.msra.mxu0 %v831_v5 }
  0x20   :  { %305 = vmatpush.bf16.msra.mxu2 %v848_v24  ;;  %425 = vmatpush.bf16.msrb.mxu3 %v859_v1 }
  0x21   :  { %225 = vmatpush.bf16.msra.mxu1 %v839_v13  ;;  %v855_v13 = vld [vmem:[#allocation5 + $0x110] sm:$0xff] }
  0x23   :  { %141 = vmatpush.bf16.msra.mxu0 %v830_v6 }
  0x24   :  { %306 = vmatpush.bf16.msra.mxu2 %v847_v27  ;;  %426 = vmatpush.bf16.msrb.mxu3 %v858_v2  ;;  %v456_v2 = vperm.slane %v1152_v28, 5 }
  0x25   :  { %226 = vmatpush.bf16.msra.mxu1 %v838_v14 }
  0x27   :  { %142 = vmatpush.bf16.msra.mxu0 %v829_v7 }
  0x28   :  { %307 = vmatpush.bf16.msra.mxu2 %v846_v30  ;;  %427 = vmatpush.bf16.msrb.mxu3 %v857_v10 }
  0x29   :  { %227 = vmatpush.bf16.msra.mxu1 %v837_v19 }
  0x2b   :  { %143 = vmatpush.bf16.msra.mxu0 %v828_v8 }
  0x2c   :  { %308 = vmatpush.bf16.msra.mxu2 %v845_v40  ;;  %428 = vmatpush.bf16.msrb.mxu3 %v856_v11 }
  0x2d   :  { %228 = vmatpush.bf16.msra.mxu1 %v836_v20 }
  0x30   :  { %309 = vmatpush.bf16.msra.mxu2 %v844_v41  ;;  %429 = vmatpush.bf16.msrb.mxu3 %v855_v13 }
  0x80   :  { %v64_v16 = vpop.permute.xlu0 %63 }
  0x81   :  { %v67_v17 = vsel %vm66_vm0, %v60_v15, %v64_v16  ;;  %v854_v15 = vld [vmem:[#allocation5 + $0x108] sm:$0xff] }
  0x82   :  { %v693_v18 = vpack.c.bf16 %v67_v17, %v67_v17  ;;  %430 = vmatpush.bf16.msrb.mxu3 %v854_v15  ;;  %v853_v17 = vld [vmem:[#allocation5 + $0x100] sm:$0xff] }
  0x84   :  { %694 = vmatmul.msk.bf16.vlgmr.msra.gmra.mxu0 %vm692_vm2, %v693_v18 }
  0x86   :  { %431 = vmatpush.bf16.msrb.mxu3 %v853_v17 }
  0x89   :  { %v321_v56 = vpop.permute.xlu0 %320 }
 0x101   :  { %v145_v32 = vpop.f32.mrf.mxu0 }
 0x102   :  { %v146_v35 = vadd.f32 %v145_v32, %v87_v31 }
 0x104   :  { %v153_v36 = vmul.f32 %v152_v34, %v146_v35  ;;  %v868_v34 = vld [vmem:[#allocation5 + $0x178] sm:$0xff] }
 0x105   :  { %505 = vmatpush.bf16.msrb.mxu0 %v868_v34 }
 0x106   :  { %v154_v37 = vmax.f32 %v146_v35, %v153_v36  ;;  %v867_v35 = vld [vmem:[#allocation5 + $0x170] sm:$0xff]  ;;  %v866_v36 = vld [vmem:[#allocation5 + $0x168] sm:$0xff] }
 0x108   :  { %v171_v38 = vpack.c.bf16 %v154_v37, %v154_v37  ;;  %v865_v37 = vld [vmem:[#allocation5 + $0x160] sm:$0xff] }
 0x109   :  { %v147_v39 = vpop.f32.mrf.mxu0  ;;  %506 = vmatpush.bf16.msrb.mxu0 %v867_v35 }
 0x10a   :  { %229 = vmatmul.bf16.vlgmr.msra.gmra.mxu1 %v171_v38  ;;  %v864_v38 = vld [vmem:[#allocation5 + $0x158] sm:$0xff]  ;;  %v863_v39 = vld [vmem:[#allocation5 + $0x150] sm:$0xff] }
 0x10d   :  { %507 = vmatpush.bf16.msrb.mxu0 %v866_v36 }
 0x111   :  { %508 = vmatpush.bf16.msrb.mxu0 %v865_v37 }
 0x115   :  { %509 = vmatpush.bf16.msrb.mxu0 %v864_v38 }
 0x119   :  { %510 = vmatpush.bf16.msrb.mxu0 %v863_v39 }
 0x11d   :  { %511 = vmatpush.bf16.msrb.mxu0 %v862_v42 }
 0x187   :  { %v230_v44 = vpop.f32.mrf.mxu1 }
 0x188   :  { %v1156_v45 = vadd.f32 %v230_v44, %v172_v43  ;;  %v861_v43 = vld [vmem:[#allocation5 + $0x140] sm:$0xff]  ;;  %v375_v44 = vperm.slane %v1152_v28, 4 }
 0x189   :  { %512 = vmatpush.bf16.msrb.mxu0 %v861_v43 }
 0x18a   :  { %v234_v46 = vmul.f32 0.2, %v1156_v45 }
 0x18c   :  { %v235_v47 = vmax.f32 %v1156_v45, %v234_v46 }
 0x18e   :  { %v252_v48 = vpack.c.bf16 %v235_v47, %v235_v47 }
 0x18f   :  { %v232_v49 = vpop.f32.mrf.mxu1 }
 0x190   :  { %310 = vmatmul.bf16.vlgmr.msra.gmra.mxu2 %v252_v48 }
 0x213   :  { %v311_v51 = vpop.f32.mrf.mxu2 }
 0x214   :  { %v312_v52 = vadd.f32 %v311_v51, %v253_v50 }
 0x216   :  { %v315_v53 = vmul.f32 0.5, %v312_v52  ;;  %567 = vst.msk [vmem:[#allocation7] sm:$0xff] %vm339_vm4, %v312_v52 }
 0x217   :  { %590 = dma.vmem_to_hbm [thread:$0]  %s586_s30, 128, %s588_s28, [#allocation4]  }
 0x218   :  { %v316_v54 = vmul.f32 1.442695, %v315_v53 }
 0x21a   :  { %894 = vpow2.f32 %v316_v54 }
 0x21b   :  { %v313_v55 = vpop.f32.mrf.mxu2  ;;  %896 = vrcp.f32 %v1087_v12 }
 0x220   :  { %v895_v57 = vpop.eup %894 }
 0x221   :  { %v323_v58 = vmul.f32 %v895_v57, %v321_v56  ;;  %v897_v14 = vpop.eup %896 }
 0x222   :  { %v526_v16 = vmul.f32 16.0, %v897_v14  ;;  %vm530_vm5 = vweird.f32 %v897_v14 }
 0x223   :  { %325 = vrot.lane.b32.xlu1 %v323_v58, %s1085_s19 }
 0x224   :  { %v527_v18 = vsub.f32 1.0, %v526_v16 }
 0x226   :  { %v528_v19 = vmul.f32 %v897_v14, %v527_v18 }
 0x228   :  { %v529_v20 = vadd.f32 %v897_v14, %v528_v19 }
 0x22a   :  { %v531_v21 = vsel %vm530_vm5, %v897_v14, %v529_v20 }
 0x22b   :  { %519 = vrot.lane.b32.xlu1 %v1156_v45, %s1086_s20 }
 0x233   :  { %890 = vrot.lane.b32.xlu1 %v889_v62, %s1082_s18 }
 0x23b   :  { %569 = vrot.lane.b32.xlu1 %v312_v52, %s1085_s19 }
 0x295   :  { %v326_v3 = vpop.permute.xlu1 %325 }
 0x296   :  { %v328_v4 = vadd.f32 %v326_v3, %v312_v52 }
 0x298   :  { %v331_v5 = vpack.c.bf16 %v328_v4, %v328_v4  ;;  %573 = vst.msk [vmem:[#allocation10] sm:$0xff] %vm339_vm4, %v328_v4 }
 0x29a   :  { %763 = vmatmul.msk.bf16.vlgmr.msra.gmra.mxu3 %vm339_vm4, %v331_v5 }
 0x29d   :  { %v520_v6 = vpop.permute.xlu1 %519 }
 0x29e   :  { %v522_v7 = vsel %vm339_vm4, %v520_v6, 0.0 }
 0x29f   :  { %523 = vadd.xlane.f32.xlu2 %v522_v7 }
 0x2a5   :  { %v1168_v8 = vpop.permute.xlu1 %890 }
 0x2a6   :  { %v892_v60 = vunpack.i.l.bf16 %v1168_v8  ;;  %v893_v63 = vunpack.i.h.bf16 %v1168_v8 }
 0x2ad   :  { %v570_v9 = vpop.permute.xlu1 %569 }
 0x2ae   :  { %572 = vst.msk [vmem:[#allocation8] sm:$0xff] %vm339_vm4, %v570_v9 }
 0x2af   :  { %601 = dma.vmem_to_hbm [thread:$0]  %s597_s22, 128, %s599_s25, [#allocation9]  }
 0x2b0   :  { %612 = dma.vmem_to_hbm [thread:$0]  %s608_s9, 128, %s610_s12, [#allocation9]  }
 0x312   :  { %v524_v22 = vpop.xlane.xlu2 %523 }
 0x313   :  { %v532_v23 = vmul.f32 %v531_v21, %v524_v22 }
 0x315   :  { %v1172_v24 = vsub.f32 %v1156_v45, %v532_v23 }
 0x317   :  { %v534_v25 = vmul.f32 %v1172_v24, %v1172_v24 }
 0x319   :  { %536 = vrot.lane.b32.xlu2 %v534_v25, %s1086_s20 }
 0x31d   :  { %v352_v27 = vpop.f32.mrf.mxu3 }
 0x31e   :  { %v353_v29 = vadd.f32 %v352_v27, %v332_v26 }
 0x320   :  { %v356_v30 = vmul.f32 0.2, %v353_v29 }
 0x322   :  { %v357_v31 = vmax.f32 %v353_v29, %v356_v30 }
 0x324   :  { %v374_v32 = vpack.c.bf16 %v357_v31, %v357_v31 }
 0x325   :  { %v354_v33 = vpop.f32.mrf.mxu3 }
 0x326   :  { %432 = vmatmul.bf16.vlgmr.msrb.gmra.mxu3 %v374_v32 }
 0x373   :  { %v537_v40 = vpop.permute.xlu2 %536 }
 0x374   :  { %v539_v41 = vsel %vm339_vm4, %v537_v40, 0.0 }
 0x375   :  { %540 = vadd.xlane.f32.xlu0 %v539_v41 }
 0x3a9   :  { %v433_v45 = vpop.f32.mrf.mxu3 }
 0x3aa   :  { %v434_v46 = vadd.f32 %v433_v45, %v375_v44 }
 0x3ac   :  { %v437_v47 = vmul.f32 0.2, %v434_v46 }
 0x3ae   :  { %v438_v48 = vmax.f32 %v434_v46, %v437_v47 }
 0x3b0   :  { %v455_v49 = vpack.c.bf16 %v438_v48, %v438_v48 }
 0x3b1   :  { %v435_v50 = vpop.f32.mrf.mxu3 }
 0x3b2   :  { %513 = vmatmul.bf16.vlgmr.msrb.gmra.mxu0 %v455_v49 }
 0x3e8   :  { %v541_v51 = vpop.xlane.xlu0 %540 }
 0x3e9   :  { %v542_v52 = vmul.f32 %v541_v51, %v531_v21 }
 0x3eb   :  { %v543_v53 = vadd.f32 1e-05, %v542_v52 }
 0x3ed   :  { %898 = vrsqrt.f32 %v543_v53  ;;  %vm550_vm7 = vweird.f32 %v543_v53 }
 0x3f3   :  { %v899_v54 = vpop.eup %898 }
 0x3f4   :  { %v545_v55 = vmul.f32 %v899_v54, %v543_v53  ;;  %vm551_vm6 = vweird.f32 %v899_v54 }
 0x3f5   :  { %vm552_vm8 = vmor %vm550_vm7, %vm551_vm6 }
 0x3f6   :  { %v546_v56 = vmul.f32 %v899_v54, %v545_v55 }
 0x3f8   :  { %v547_v57 = vmul.f32 0.5, %v546_v56 }
 0x3fa   :  { %v548_v58 = vsub.f32 1.5, %v547_v57 }
 0x3fc   :  { %v549_v59 = vmul.f32 %v899_v54, %v548_v58 }
 0x3fe   :  { %v553_v61 = vsel %vm552_vm8, %v899_v54, %v549_v59 }
 0x3ff   :  { %v554_v62 = vmul.f32 %v553_v61, %v1172_v24 }
 0x401   :  { %v560_v0 = vmul.f32 %v892_v60, %v554_v62 }
 0x403   :  { %v566_v1 = vadd.f32 %v893_v63, %v560_v0 }
 0x405   :  { %576 = vrot.lane.b32.xlu1 %v566_v1, %s1086_s20 }
 0x42f   :  { %v514_v3 = vpop.f32.mrf.mxu0 }
 0x430   :  { %v515_v4 = vadd.f32 %v514_v3, %v456_v2 }
 0x432   :  { %574 = vst.msk [vmem:[#allocation11] sm:$0xff] %vm66_vm0, %v515_v4 }
 0x433   :  { %623 = dma.vmem_to_hbm [thread:$0]  %s619_s13, 128, %s621_s16, [#allocation12]  }
 0x437   :  { %v516_v5 = vpop.f32.mrf.mxu0 }
 0x477   :  { %v577_v28 = vpop.permute.xlu1 %576 }
 0x478   :  { %579 = vst.msk [vmem:[#allocation13] sm:$0xff] %vm339_vm4, %v577_v28 }
 0x479   :  { %634 = dma.vmem_to_hbm [thread:$0]  %s630_s2, 128, %s632_s1, [#allocation12]  }
 0x47a   :  { %1072 = dma.done.wait [#allocation4], 128  }
 0x47b   :  { %1073 = vsyncadd [#allocation4], 4294967168 }
 0x47c   :  { %1074 = dma.done.wait [#allocation9], 256  }
 0x47d   :  { %1075 = vsyncadd [#allocation9], 4294967040 }
 0x47e   :  { %1076 = dma.done.wait [#allocation12], 256  }
 0x47f   :  { %1077 = vsyncadd [#allocation12], 4294967040 }
 0x480   :  { %655 = vsyncpa [#allocation3], 1 }
 0x481   :  { %656 = vsyncpa [#allocation6], 1 }
 0x482   :  { %657 = vsyncpa [#allocation4], 1 }
 0x483   :  { %658 = vsyncpa [#allocation9], 1 }
 0x484   :  { %659 = vsyncpa [#allocation12], 1 }

</bundles_post_ra>
